<compile_context>
chip_gen: v6e
topology: v6e:2x2x1
jax: 0.10.0
libtpu: 0.0.40
codegen_flags: <defaults>
</compile_context>

<pallas_src>
import functools

import jax
import jax.numpy as jnp
from jax.experimental import pallas as pl
from jax.experimental.pallas import tpu as pltpu


K1 = 5          # conv1 kernel size
K1_PAD = 128    # conv1 im2col contraction dim (k*Cin = 50) zero-padded to 128


# ----------------------------------------------------------------------------
# Fused kernel
# ----------------------------------------------------------------------------
def _shift_down(h):
    """result[i] = h[i-1], result[0] = 0."""
    return jnp.concatenate([jnp.zeros_like(h[:1]), h[:-1]], axis=0)


def _shift_up(h):
    """result[i] = h[i+1], result[-1] = 0."""
    return jnp.concatenate([h[1:], jnp.zeros_like(h[:1])], axis=0)


def _conv3_same_relu(h, w_flat, bias):
    """'same' Conv1d (k=3) + ReLU as a single im2col matmul.

    h: (L, Cin), w_flat: (3*Cin, Cout) in tap-major order, bias: (1, Cout).
    """
    cols = jnp.concatenate([_shift_down(h), h, _shift_up(h)], axis=-1)
    return jnp.maximum(
        jnp.dot(cols, w_flat, preferred_element_type=jnp.float32) + bias, 0.0)


def fused_discriminator_kernel(xcol_ref, w1_ref, b1_ref, w2_ref, b2_ref,
                               w3_ref, b3_ref, w4_ref, b4_ref,
                               lw1_ref, lb1_ref, lw2p_ref, lb2p_ref,
                               out_ref, *, batch, length):
    """Whole forward pass, everything resident in VMEM.

    xcol_ref : (B*L, K1_PAD)    conv1 im2col (zero-padded K)
    w1_ref   : (K1_PAD, 256)    conv1 weight, flattened + zero-padded rows
    w{2,3,4} : (3*Cin, Cout)    conv weights, tap-major flattened
    lw1_ref  : (16, 100), lw2p_ref: (100, 2) (linear2 weight duplicated)
    out_ref  : (L, 2)           column 0 = sigmoid(logit), column 1 = logit
    """
    # conv1 over the flattened batch (M = B*L rows on the MXU), ReLU, then the
    # batch mean, reduced with sublane-aligned (multiple-of-L) slices.
    h1 = jnp.maximum(
        jnp.dot(xcol_ref[...], w1_ref[...], preferred_element_type=jnp.float32)
        + b1_ref[...], 0.0)                                    # (B*L, 256)
    hm = h1[0:length]
    for b in range(1, batch):                                  # static unroll
        hm = hm + h1[b * length:(b + 1) * length]
    hm = hm * (1.0 / batch)                                    # (L, 256)

    h2 = _conv3_same_relu(hm, w2_ref[...], b2_ref[...])        # (L, 128)
    h3 = _conv3_same_relu(h2, w3_ref[...], b3_ref[...])        # (L, 64)
    h4 = _conv3_same_relu(h3, w4_ref[...], b4_ref[...])        # (L, 16)

    # Head: linear1 -> linear2 (NO ReLU between them, as in the PyTorch code).
    fc = jnp.dot(h4, lw1_ref[...],
                 preferred_element_type=jnp.float32) + lb1_ref[...]   # (L, 100)
    logit2 = jnp.dot(fc, lw2p_ref[...],
                     preferred_element_type=jnp.float32) + lb2p_ref[...]  # (L, 2)
    col = jax.lax.broadcasted_iota(jnp.int32, logit2.shape, 1)
    out_ref[...] = jnp.where(col == 0, jax.nn.sigmoid(logit2), logit2)


# ----------------------------------------------------------------------------
# Wrapper (plain-JAX glue: im2col for conv1, weight flattening, one pallas_call)
# ----------------------------------------------------------------------------
def discriminator_conditional_forward(params, x, conditioning):
    """Mirrors discriminator_condintional.forward.

    x: (B, L, Cx), conditioning: (B, L, Cc) with Cx + Cc == 10.
    Returns (D_prob, D_logit), each of shape (1, L, 1).
    """
    xc = jnp.concatenate([x, conditioning], axis=-1).astype(jnp.float32)
    B, L, cin = xc.shape

    # conv1 im2col over the whole batch, tap-major columns, K padded to 128.
    p = K1 // 2
    xp = jnp.pad(xc, ((0, 0), (p, K1 - 1 - p), (0, 0)))
    cols = jnp.stack([xp[:, t:t + L, :] for t in range(K1)], axis=2)  # (B,L,k,Cin)
    cols = cols.reshape(B * L, K1 * cin)
    cols = jnp.pad(cols, ((0, 0), (0, K1_PAD - K1 * cin)))            # (B*L, 128)

    w1 = params["w1"]                                   # (5, 10, 256)
    k1, c1_in, c1_out = w1.shape
    w1f = jnp.pad(w1.reshape(k1 * c1_in, c1_out),
                  ((0, K1_PAD - k1 * c1_in), (0, 0)))   # (128, 256)

    def flat_w(w):
        k, ci, co = w.shape
        return w.reshape(k * ci, co)

    w2f, w3f, w4f = flat_w(params["w2"]), flat_w(params["w3"]), flat_w(params["w4"])
    b1 = params["b1"].reshape(1, -1)
    b2 = params["b2"].reshape(1, -1)
    b3 = params["b3"].reshape(1, -1)
    b4 = params["b4"].reshape(1, -1)
    lw1 = params["lw1"]
    lb1 = params["lb1"].reshape(1, -1)
    # Pack the 1-wide final linear into 2 lanes (col 0 -> prob, col 1 -> logit).
    lw2p = jnp.concatenate([params["lw2"], params["lw2"]], axis=1)    # (100, 2)
    lb2p = jnp.concatenate([params["lb2"], params["lb2"]]).reshape(1, 2)

    kernel = functools.partial(fused_discriminator_kernel, batch=B, length=L)

    def full(shape):
        return pl.BlockSpec(shape, lambda i, _s=shape: (0,) * len(_s))

    out = pl.pallas_call(
        kernel,
        out_shape=jax.ShapeDtypeStruct((L, 2), jnp.float32),
        grid=(1,),
        in_specs=[
            full(cols.shape), full(w1f.shape), full(b1.shape),
            full(w2f.shape), full(b2.shape),
            full(w3f.shape), full(b3.shape),
            full(w4f.shape), full(b4.shape),
            full(lw1.shape), full(lb1.shape),
            full(lw2p.shape), full(lb2p.shape),
        ],
        out_specs=full((L, 2)),
        compiler_params=pltpu.CompilerParams(
            dimension_semantics=("arbitrary",)),
    )(cols, w1f, b1, w2f, b2, w3f, b3, w4f, b4, lw1, lb1, lw2p, lb2p)

    prob = out[:, 0:1][None]    # (1, L, 1)
    logit = out[:, 1:2][None]   # (1, L, 1)
    return prob, logit


# ----------------------------------------------------------------------------
# Deterministic parameter init (PyTorch-default-like uniform)
# ----------------------------------------------------------------------------
def init_params(key):
    def u(k, shape, fan_in):
        bound = 1.0 / float(fan_in) ** 0.5
        return jax.random.uniform(k, shape, jnp.float32, -bound, bound)

    ks = jax.random.split(key, 12)
    return {
        "w1": u(ks[0], (5, 10, 256), 10 * 5),   "b1": u(ks[1], (256,), 10 * 5),
        "w2": u(ks[2], (3, 256, 128), 256 * 3), "b2": u(ks[3], (128,), 256 * 3),
        "w3": u(ks[4], (3, 128, 64), 128 * 3),  "b3": u(ks[5], (64,), 128 * 3),
        "w4": u(ks[6], (3, 64, 16), 64 * 3),    "b4": u(ks[7], (16,), 64 * 3),
        "lw1": u(ks[8], (16, 100), 16),         "lb1": u(ks[9], (100,), 16),
        "lw2": u(ks[10], (100, 1), 100),        "lb2": u(ks[11], (1,), 100),
    }


# ----------------------------------------------------------------------------
# Pure-JAX reference (same math) for a sanity check
# ----------------------------------------------------------------------------
def reference_forward(params, x, conditioning):
    xc = jnp.concatenate([x, conditioning], axis=-1).astype(jnp.float32)

    def conv(xb, w, b):
        L = xb.shape[0]
        k = w.shape[0]
        p = k // 2
        xpad = jnp.pad(xb, ((p, k - 1 - p), (0, 0)))
        out = b[None, :]
        for t in range(k):
            out = out + xpad[t:t + L] @ w[t]
        return jnp.maximum(out, 0.0)

    h = jnp.mean(jax.vmap(lambda xb: conv(xb, params["w1"], params["b1"]))(xc),
                 axis=0)
    h = conv(h, params["w2"], params["b2"])
    h = conv(h, params["w3"], params["b3"])
    h = conv(h, params["w4"], params["b4"])
    fc = h @ params["lw1"] + params["lb1"]
    logit = fc @ params["lw2"] + params["lb2"]
    return jax.nn.sigmoid(logit)[None], logit[None]


if __name__ == "__main__":
    key = jax.random.PRNGKey(0)
    pkey, xkey, ckey = jax.random.split(key, 3)
    params = init_params(pkey)

    B, L = 2, 16
    x = jax.random.normal(xkey, (B, L, 4), jnp.float32)      # real/fake signal
    cond = jax.random.normal(ckey, (B, L, 6), jnp.float32)   # conditioning
    # concatenated channel count = 4 + 6 = 10 = conv1 in_channels

    fwd = jax.jit(discriminator_conditional_forward)
    prob, logit = fwd(params, x, cond)
    jax.block_until_ready((prob, logit))

    prob_ref, logit_ref = reference_forward(params, x, cond)

    assert prob.shape == (1, L, 1) and logit.shape == (1, L, 1)
    assert bool(jnp.all(jnp.isfinite(prob))) and bool(jnp.all(jnp.isfinite(logit)))
    assert bool(jnp.allclose(logit, logit_ref, atol=2e-2, rtol=2e-2))
    assert bool(jnp.allclose(prob, prob_ref, atol=2e-2, rtol=2e-2))

    print("KERNEL_OK")
</pallas_src>

<mosaic_0001>
module attributes {stable_mosaic.version = 11 : i64} {
  func.func @fused_discriminator_kernel(%arg0: i32, %arg1: memref<32x128xf32, #tpu.memory_space<vmem>>, %arg2: memref<128x256xf32, #tpu.memory_space<vmem>>, %arg3: memref<1x256xf32, #tpu.memory_space<vmem>>, %arg4: memref<768x128xf32, #tpu.memory_space<vmem>>, %arg5: memref<1x128xf32, #tpu.memory_space<vmem>>, %arg6: memref<384x64xf32, #tpu.memory_space<vmem>>, %arg7: memref<1x64xf32, #tpu.memory_space<vmem>>, %arg8: memref<192x16xf32, #tpu.memory_space<vmem>>, %arg9: memref<1x16xf32, #tpu.memory_space<vmem>>, %arg10: memref<16x100xf32, #tpu.memory_space<vmem>>, %arg11: memref<1x100xf32, #tpu.memory_space<vmem>>, %arg12: memref<100x2xf32, #tpu.memory_space<vmem>>, %arg13: memref<1x2xf32, #tpu.memory_space<vmem>>, %arg14: memref<16x2xf32, #tpu.memory_space<vmem>>) attributes {dimension_semantics = [#tpu.dimension_semantics<arbitrary>], iteration_bounds = array<i64: 1>, scalar_prefetch = 0 : i64, scratch_operands = 0 : i64, tpu.core_type = #tpu.core_type<tc>, window_params = [{pipeline_mode = #tpu.pipeline_mode<synchronous>, transform_indices = @transform_0, window_bounds = array<i64: 32, 128>}, {pipeline_mode = #tpu.pipeline_mode<synchronous>, transform_indices = @transform_1, window_bounds = array<i64: 128, 256>}, {pipeline_mode = #tpu.pipeline_mode<synchronous>, transform_indices = @transform_2, window_bounds = array<i64: 1, 256>}, {pipeline_mode = #tpu.pipeline_mode<synchronous>, transform_indices = @transform_3, window_bounds = array<i64: 768, 128>}, {pipeline_mode = #tpu.pipeline_mode<synchronous>, transform_indices = @transform_4, window_bounds = array<i64: 1, 128>}, {pipeline_mode = #tpu.pipeline_mode<synchronous>, transform_indices = @transform_5, window_bounds = array<i64: 384, 64>}, {pipeline_mode = #tpu.pipeline_mode<synchronous>, transform_indices = @transform_6, window_bounds = array<i64: 1, 64>}, {pipeline_mode = #tpu.pipeline_mode<synchronous>, transform_indices = @transform_7, window_bounds = array<i64: 192, 16>}, {pipeline_mode = #tpu.pipeline_mode<synchronous>, transform_indices = @transform_8, window_bounds = array<i64: 1, 16>}, {pipeline_mode = #tpu.pipeline_mode<synchronous>, transform_indices = @transform_9, window_bounds = array<i64: 16, 100>}, {pipeline_mode = #tpu.pipeline_mode<synchronous>, transform_indices = @transform_10, window_bounds = array<i64: 1, 100>}, {pipeline_mode = #tpu.pipeline_mode<synchronous>, transform_indices = @transform_11, window_bounds = array<i64: 100, 2>}, {pipeline_mode = #tpu.pipeline_mode<synchronous>, transform_indices = @transform_12, window_bounds = array<i64: 1, 2>}, {pipeline_mode = #tpu.pipeline_mode<synchronous>, transform_indices = @transform_13, window_bounds = array<i64: 16, 2>}]} {
    %c0 = arith.constant 0 : index
    %c0_0 = arith.constant 0 : index
    %0 = vector.load %arg1[%c0, %c0_0] : memref<32x128xf32, #tpu.memory_space<vmem>>, vector<32x128xf32>
    %c0_1 = arith.constant 0 : index
    %c0_2 = arith.constant 0 : index
    %1 = vector.load %arg2[%c0_1, %c0_2] : memref<128x256xf32, #tpu.memory_space<vmem>>, vector<128x256xf32>
    %cst = arith.constant dense<0.000000e+00> : vector<32x256xf32>
    %2 = tpu.matmul %0, %1, %cst {dimension_numbers = #tpu.dot_dimension_numbers<[1], [0], [0], [1], [0, 0, 1, 1], [], []>} : vector<32x128xf32>, vector<128x256xf32>, vector<32x256xf32> -> vector<32x256xf32>
    %c0_3 = arith.constant 0 : index
    %c0_4 = arith.constant 0 : index
    %3 = vector.load %arg3[%c0_3, %c0_4] : memref<1x256xf32, #tpu.memory_space<vmem>>, vector<1x256xf32>
    %4 = vector.broadcast %3 : vector<1x256xf32> to vector<32x256xf32>
    %5 = arith.addf %2, %4 : vector<32x256xf32>
    %cst_5 = arith.constant 0.000000e+00 : f32
    %6 = vector.broadcast %cst_5 : f32 to vector<32x256xf32>
    %7 = arith.maximumf %5, %6 : vector<32x256xf32>
    %8 = vector.extract_strided_slice %7 {offsets = [0, 0], sizes = [16, 256], strides = [1, 1]} : vector<32x256xf32> to vector<16x256xf32>
    %9 = vector.extract_strided_slice %7 {offsets = [16, 0], sizes = [16, 256], strides = [1, 1]} : vector<32x256xf32> to vector<16x256xf32>
    %10 = arith.addf %8, %9 : vector<16x256xf32>
    %cst_6 = arith.constant 5.000000e-01 : f32
    %11 = vector.broadcast %cst_6 : f32 to vector<16x256xf32>
    %12 = arith.mulf %10, %11 : vector<16x256xf32>
    %c0_7 = arith.constant 0 : index
    %c0_8 = arith.constant 0 : index
    %13 = vector.load %arg4[%c0_7, %c0_8] : memref<768x128xf32, #tpu.memory_space<vmem>>, vector<768x128xf32>
    %c0_9 = arith.constant 0 : index
    %c0_10 = arith.constant 0 : index
    %14 = vector.load %arg5[%c0_9, %c0_10] : memref<1x128xf32, #tpu.memory_space<vmem>>, vector<1x128xf32>
    %cst_11 = arith.constant 0.000000e+00 : f32
    %15 = vector.broadcast %cst_11 : f32 to vector<1x256xf32>
    %16 = vector.extract_strided_slice %12 {offsets = [0, 0], sizes = [15, 256], strides = [1, 1]} : vector<16x256xf32> to vector<15x256xf32>
    %17 = tpu.concatenate %15, %16 in 0 : vector<1x256xf32>, vector<15x256xf32> -> vector<16x256xf32>
    %18 = vector.extract_strided_slice %12 {offsets = [1, 0], sizes = [15, 256], strides = [1, 1]} : vector<16x256xf32> to vector<15x256xf32>
    %cst_12 = arith.constant 0.000000e+00 : f32
    %19 = vector.broadcast %cst_12 : f32 to vector<1x256xf32>
    %20 = tpu.concatenate %18, %19 in 0 : vector<15x256xf32>, vector<1x256xf32> -> vector<16x256xf32>
    %21 = tpu.concatenate %17, %12, %20 in 1 : vector<16x256xf32>, vector<16x256xf32>, vector<16x256xf32> -> vector<16x768xf32>
    %cst_13 = arith.constant dense<0.000000e+00> : vector<16x128xf32>
    %22 = tpu.matmul %21, %13, %cst_13 {dimension_numbers = #tpu.dot_dimension_numbers<[1], [0], [0], [1], [0, 0, 1, 1], [], []>} : vector<16x768xf32>, vector<768x128xf32>, vector<16x128xf32> -> vector<16x128xf32>
    %23 = vector.broadcast %14 : vector<1x128xf32> to vector<16x128xf32>
    %24 = arith.addf %22, %23 : vector<16x128xf32>
    %cst_14 = arith.constant 0.000000e+00 : f32
    %25 = vector.broadcast %cst_14 : f32 to vector<16x128xf32>
    %26 = arith.maximumf %24, %25 : vector<16x128xf32>
    %c0_15 = arith.constant 0 : index
    %c0_16 = arith.constant 0 : index
    %27 = vector.load %arg6[%c0_15, %c0_16] : memref<384x64xf32, #tpu.memory_space<vmem>>, vector<384x64xf32>
    %c0_17 = arith.constant 0 : index
    %c0_18 = arith.constant 0 : index
    %28 = vector.load %arg7[%c0_17, %c0_18] : memref<1x64xf32, #tpu.memory_space<vmem>>, vector<1x64xf32>
    %cst_19 = arith.constant 0.000000e+00 : f32
    %29 = vector.broadcast %cst_19 : f32 to vector<1x128xf32>
    %30 = vector.extract_strided_slice %26 {offsets = [0, 0], sizes = [15, 128], strides = [1, 1]} : vector<16x128xf32> to vector<15x128xf32>
    %31 = tpu.concatenate %29, %30 in 0 : vector<1x128xf32>, vector<15x128xf32> -> vector<16x128xf32>
    %32 = vector.extract_strided_slice %26 {offsets = [1, 0], sizes = [15, 128], strides = [1, 1]} : vector<16x128xf32> to vector<15x128xf32>
    %cst_20 = arith.constant 0.000000e+00 : f32
    %33 = vector.broadcast %cst_20 : f32 to vector<1x128xf32>
    %34 = tpu.concatenate %32, %33 in 0 : vector<15x128xf32>, vector<1x128xf32> -> vector<16x128xf32>
    %35 = tpu.concatenate %31, %26, %34 in 1 : vector<16x128xf32>, vector<16x128xf32>, vector<16x128xf32> -> vector<16x384xf32>
    %cst_21 = arith.constant dense<0.000000e+00> : vector<16x64xf32>
    %36 = tpu.matmul %35, %27, %cst_21 {dimension_numbers = #tpu.dot_dimension_numbers<[1], [0], [0], [1], [0, 0, 1, 1], [], []>} : vector<16x384xf32>, vector<384x64xf32>, vector<16x64xf32> -> vector<16x64xf32>
    %37 = vector.broadcast %28 : vector<1x64xf32> to vector<16x64xf32>
    %38 = arith.addf %36, %37 : vector<16x64xf32>
    %cst_22 = arith.constant 0.000000e+00 : f32
    %39 = vector.broadcast %cst_22 : f32 to vector<16x64xf32>
    %40 = arith.maximumf %38, %39 : vector<16x64xf32>
    %c0_23 = arith.constant 0 : index
    %c0_24 = arith.constant 0 : index
    %41 = vector.load %arg8[%c0_23, %c0_24] : memref<192x16xf32, #tpu.memory_space<vmem>>, vector<192x16xf32>
    %c0_25 = arith.constant 0 : index
    %c0_26 = arith.constant 0 : index
    %42 = vector.load %arg9[%c0_25, %c0_26] : memref<1x16xf32, #tpu.memory_space<vmem>>, vector<1x16xf32>
    %cst_27 = arith.constant 0.000000e+00 : f32
    %43 = vector.broadcast %cst_27 : f32 to vector<1x64xf32>
    %44 = vector.extract_strided_slice %40 {offsets = [0, 0], sizes = [15, 64], strides = [1, 1]} : vector<16x64xf32> to vector<15x64xf32>
    %45 = tpu.concatenate %43, %44 in 0 : vector<1x64xf32>, vector<15x64xf32> -> vector<16x64xf32>
    %46 = vector.extract_strided_slice %40 {offsets = [1, 0], sizes = [15, 64], strides = [1, 1]} : vector<16x64xf32> to vector<15x64xf32>
    %cst_28 = arith.constant 0.000000e+00 : f32
    %47 = vector.broadcast %cst_28 : f32 to vector<1x64xf32>
    %48 = tpu.concatenate %46, %47 in 0 : vector<15x64xf32>, vector<1x64xf32> -> vector<16x64xf32>
    %49 = tpu.concatenate %45, %40, %48 in 1 : vector<16x64xf32>, vector<16x64xf32>, vector<16x64xf32> -> vector<16x192xf32>
    %cst_29 = arith.constant dense<0.000000e+00> : vector<16x16xf32>
    %50 = tpu.matmul %49, %41, %cst_29 {dimension_numbers = #tpu.dot_dimension_numbers<[1], [0], [0], [1], [0, 0, 1, 1], [], []>} : vector<16x192xf32>, vector<192x16xf32>, vector<16x16xf32> -> vector<16x16xf32>
    %51 = vector.broadcast %42 : vector<1x16xf32> to vector<16x16xf32>
    %52 = arith.addf %50, %51 : vector<16x16xf32>
    %cst_30 = arith.constant 0.000000e+00 : f32
    %53 = vector.broadcast %cst_30 : f32 to vector<16x16xf32>
    %54 = arith.maximumf %52, %53 : vector<16x16xf32>
    %c0_31 = arith.constant 0 : index
    %c0_32 = arith.constant 0 : index
    %55 = vector.load %arg10[%c0_31, %c0_32] : memref<16x100xf32, #tpu.memory_space<vmem>>, vector<16x100xf32>
    %cst_33 = arith.constant dense<0.000000e+00> : vector<16x100xf32>
    %56 = tpu.matmul %54, %55, %cst_33 {dimension_numbers = #tpu.dot_dimension_numbers<[1], [0], [0], [1], [0, 0, 1, 1], [], []>} : vector<16x16xf32>, vector<16x100xf32>, vector<16x100xf32> -> vector<16x100xf32>
    %c0_34 = arith.constant 0 : index
    %c0_35 = arith.constant 0 : index
    %57 = vector.load %arg11[%c0_34, %c0_35] : memref<1x100xf32, #tpu.memory_space<vmem>>, vector<1x100xf32>
    %58 = vector.broadcast %57 : vector<1x100xf32> to vector<16x100xf32>
    %59 = arith.addf %56, %58 : vector<16x100xf32>
    %c0_36 = arith.constant 0 : index
    %c0_37 = arith.constant 0 : index
    %60 = vector.load %arg12[%c0_36, %c0_37] : memref<100x2xf32, #tpu.memory_space<vmem>>, vector<100x2xf32>
    %cst_38 = arith.constant dense<0.000000e+00> : vector<16x2xf32>
    %61 = tpu.matmul %59, %60, %cst_38 {dimension_numbers = #tpu.dot_dimension_numbers<[1], [0], [0], [1], [0, 0, 1, 1], [], []>} : vector<16x100xf32>, vector<100x2xf32>, vector<16x2xf32> -> vector<16x2xf32>
    %c0_39 = arith.constant 0 : index
    %c0_40 = arith.constant 0 : index
    %62 = vector.load %arg13[%c0_39, %c0_40] : memref<1x2xf32, #tpu.memory_space<vmem>>, vector<1x2xf32>
    %63 = vector.broadcast %62 : vector<1x2xf32> to vector<16x2xf32>
    %64 = arith.addf %61, %63 : vector<16x2xf32>
    %65 = tpu.iota {dimensions = array<i32: 1>} : vector<16x2xi32>
    %c0_i32 = arith.constant 0 : i32
    %66 = vector.broadcast %c0_i32 : i32 to vector<16x2xi32>
    %67 = arith.cmpi eq, %65, %66 : vector<16x2xi32>
    %68 = arith.negf %64 : vector<16x2xf32>
    %69 = math.exp %68 : vector<16x2xf32>
    %cst_41 = arith.constant 1.000000e+00 : f32
    %70 = vector.broadcast %cst_41 : f32 to vector<16x2xf32>
    %71 = arith.addf %70, %69 : vector<16x2xf32>
    %72 = arith.divf %70, %71 : vector<16x2xf32>
    %73 = arith.select %67, %72, %64 : vector<16x2xi1>, vector<16x2xf32>
    %c0_42 = arith.constant 0 : index
    %c0_43 = arith.constant 0 : index
    %74 = vector.load %arg14[%c0_42, %c0_43] : memref<16x2xf32, #tpu.memory_space<vmem>>, vector<16x2xf32>
    tpu.vector_store %arg14[%c0_42, %c0_43], %73 {strides = array<i32>} : memref<16x2xf32, #tpu.memory_space<vmem>>, vector<16x2xf32>,
    return
  }
  func.func @transform_0(%arg0: i32) -> (i32, i32) {
    %c0_i32 = arith.constant 0 : i32
    %c0_i32_0 = arith.constant 0 : i32
    %c0_i32_1 = arith.constant 0 : i32
    return %c0_i32, %c0_i32_0 : i32, i32
  }
  func.func @transform_1(%arg0: i32) -> (i32, i32) {
    %c0_i32 = arith.constant 0 : i32
    %c0_i32_0 = arith.constant 0 : i32
    %c0_i32_1 = arith.constant 0 : i32
    return %c0_i32, %c0_i32_0 : i32, i32
  }
  func.func @transform_2(%arg0: i32) -> (i32, i32) {
    %c0_i32 = arith.constant 0 : i32
    %c0_i32_0 = arith.constant 0 : i32
    %c0_i32_1 = arith.constant 0 : i32
    return %c0_i32, %c0_i32_0 : i32, i32
  }
  func.func @transform_3(%arg0: i32) -> (i32, i32) {
    %c0_i32 = arith.constant 0 : i32
    %c0_i32_0 = arith.constant 0 : i32
    %c0_i32_1 = arith.constant 0 : i32
    return %c0_i32, %c0_i32_0 : i32, i32
  }
  func.func @transform_4(%arg0: i32) -> (i32, i32) {
    %c0_i32 = arith.constant 0 : i32
    %c0_i32_0 = arith.constant 0 : i32
    %c0_i32_1 = arith.constant 0 : i32
    return %c0_i32, %c0_i32_0 : i32, i32
  }
  func.func @transform_5(%arg0: i32) -> (i32, i32) {
    %c0_i32 = arith.constant 0 : i32
    %c0_i32_0 = arith.constant 0 : i32
    %c0_i32_1 = arith.constant 0 : i32
    return %c0_i32, %c0_i32_0 : i32, i32
  }
  func.func @transform_6(%arg0: i32) -> (i32, i32) {
    %c0_i32 = arith.constant 0 : i32
    %c0_i32_0 = arith.constant 0 : i32
    %c0_i32_1 = arith.constant 0 : i32
    return %c0_i32, %c0_i32_0 : i32, i32
  }
  func.func @transform_7(%arg0: i32) -> (i32, i32) {
    %c0_i32 = arith.constant 0 : i32
    %c0_i32_0 = arith.constant 0 : i32
    %c0_i32_1 = arith.constant 0 : i32
    return %c0_i32, %c0_i32_0 : i32, i32
  }
  func.func @transform_8(%arg0: i32) -> (i32, i32) {
    %c0_i32 = arith.constant 0 : i32
    %c0_i32_0 = arith.constant 0 : i32
    %c0_i32_1 = arith.constant 0 : i32
    return %c0_i32, %c0_i32_0 : i32, i32
  }
  func.func @transform_9(%arg0: i32) -> (i32, i32) {
    %c0_i32 = arith.constant 0 : i32
    %c0_i32_0 = arith.constant 0 : i32
    %c0_i32_1 = arith.constant 0 : i32
    return %c0_i32, %c0_i32_0 : i32, i32
  }
  func.func @transform_10(%arg0: i32) -> (i32, i32) {
    %c0_i32 = arith.constant 0 : i32
    %c0_i32_0 = arith.constant 0 : i32
    %c0_i32_1 = arith.constant 0 : i32
    return %c0_i32, %c0_i32_0 : i32, i32
  }
  func.func @transform_11(%arg0: i32) -> (i32, i32) {
    %c0_i32 = arith.constant 0 : i32
    %c0_i32_0 = arith.constant 0 : i32
    %c0_i32_1 = arith.constant 0 : i32
    return %c0_i32, %c0_i32_0 : i32, i32
  }
  func.func @transform_12(%arg0: i32) -> (i32, i32) {
    %c0_i32 = arith.constant 0 : i32
    %c0_i32_0 = arith.constant 0 : i32
    %c0_i32_1 = arith.constant 0 : i32
    return %c0_i32, %c0_i32_0 : i32, i32
  }
  func.func @transform_13(%arg0: i32) -> (i32, i32) {
    %c0_i32 = arith.constant 0 : i32
    %c0_i32_0 = arith.constant 0 : i32
    %c0_i32_1 = arith.constant 0 : i32
    return %c0_i32, %c0_i32_0 : i32, i32
  }
}

</mosaic_0001>

<bundles_post_ra>
// kernel: discriminator_conditional_forward.1
= control target key start
LH: loop header
LB: loop body
LE: loop exit
PB: predicated region body
PF: predicated region fallthrough
CT: control target
= control target key end

     0   :  { %v1427_v3 = vmov 0.0   ;;  %vm298_vm0 = vcmask 1040384   ;;  %vm311_vm2 = vcmask 1046528   ;;  %vm822_vm3 = vcmask 523264   ;;  %s2259_s1 = inlined_call_operand.vmem [shape: f32[128,256], index: 1, kind: input, shape index: {}]   ;;  %s2260_s3 = inlined_call_operand.vmem [shape: f32[768,128], index: 3, kind: input, shape index: {}]   ;;  %s2261_s0 = inlined_call_operand.vmem [shape: f32[32,128], index: 0, kind: input, shape index: {}]   ;;  %s2262_s2 = inlined_call_operand.vmem [shape: f32[1,256], index: 2, kind: input, shape index: {}]   ;;  %s2263_s5 = inlined_call_operand.vmem [shape: f32[384,64], index: 5, kind: input, shape index: {}]   ;;  %s2264_s4 = inlined_call_operand.vmem [shape: f32[1,128], index: 4, kind: input, shape index: {}]   ;;  %s2265_s7 = inlined_call_operand.vmem [shape: f32[192,16], index: 7, kind: input, shape index: {}]   ;;  %s2266_s6 = inlined_call_operand.vmem [shape: f32[1,64], index: 6, kind: input, shape index: {}]   ;;  %s2267_s9 = inlined_call_operand.vmem [shape: f32[16,100], index: 9, kind: input, shape index: {}]   ;;  %s2268_s11 = inlined_call_operand.vmem [shape: f32[100,2], index: 11, kind: input, shape index: {}]   ;;  %s2269_s8 = inlined_call_operand.vmem [shape: f32[1,16], index: 8, kind: input, shape index: {}]   ;;  %s2270_s10 = inlined_call_operand.vmem [shape: f32[1,100], index: 10, kind: input, shape index: {}]   ;;  %s2271_s12 = inlined_call_operand.vmem [shape: f32[1,2], index: 12, kind: input, shape index: {}]   ;;  %s2272_s13 = inlined_call_operand.vmem [shape: f32[16,2], index: 13, kind: output, shape index: {}]  }
   0x1   :  { %v79_v0 = vld [vmem:[%s2259_s1 + $0xf8] sm:$0xff]  ;;  %v78_v1 = vld [vmem:[%s2259_s1 + $0xf0] sm:$0xff]  ;;  %v77_v2 = vld [vmem:[%s2259_s1 + $0xe8] sm:$0xff]  ;;  %156 = vmatprep.mubr.f32.mxu0 %v1427_v3  ;;  %vm1031_vm4 = vcmask 1043456   ;;  %vm922_vm5 = vcmask 130048   ;;  %vm1024_vm6 = vcmask 818176  }
   0x2   :  { %92 = vmatprep.subr.mxu0 %v79_v0  ;;  %v76_v4 = vld [vmem:[%s2259_s1 + $0xe0] sm:$0xff]  ;;  %v75_v5 = vld [vmem:[%s2259_s1 + $0xd8] sm:$0xff]  ;;  %v74_v6 = vld [vmem:[%s2259_s1 + $0xd0] sm:$0xff]  ;;  %vm1127_vm8 = vcmask 15360  }
   0x3   :  { %93 = vmatpush1.msra.mxu0 %v78_v1  ;;  %v73_v7 = vld [vmem:[%s2259_s1 + $0xc8] sm:$0xff]  ;;  %v72_v8 = vld [vmem:[%s2259_s1 + $0xc0] sm:$0xff]  ;;  %v71_v9 = vld [vmem:[%s2259_s1 + $0xb8] sm:$0xff] }
   0x4   :  { %94 = vmatprep.subr.mxu0 %v77_v2  ;;  %v70_v10 = vld [vmem:[%s2259_s1 + $0xb0] sm:$0xff]  ;;  %v69_v11 = vld [vmem:[%s2259_s1 + $0xa8] sm:$0xff]  ;;  %v68_v12 = vld [vmem:[%s2259_s1 + $0xa0] sm:$0xff] }
   0x5   :  { %95 = vmatpush1.msra.mxu0 %v76_v4  ;;  %v67_v13 = vld [vmem:[%s2259_s1 + $0x98] sm:$0xff]  ;;  %v66_v14 = vld [vmem:[%s2259_s1 + $0x90] sm:$0xff]  ;;  %v65_v15 = vld [vmem:[%s2259_s1 + $0x88] sm:$0xff] }
   0x6   :  { %96 = vmatprep.subr.mxu0 %v75_v5  ;;  %v228_v16 = vld [vmem:[%s2260_s3 + $0xf8] sm:$0xff]  ;;  %v64_v17 = vld [vmem:[%s2259_s1 + $0x80] sm:$0xff]  ;;  %v227_v19 = vld [vmem:[%s2260_s3 + $0xf0] sm:$0xff] }
   0x7   :  { %97 = vmatpush1.msra.mxu0 %v74_v6  ;;  %1157 = vmatprep.subr.mxu1 %v228_v16  ;;  %v212_v18 = vld [vmem:[%s2260_s3 + $0x78] sm:$0xff]  ;;  %v211_v21 = vld [vmem:[%s2260_s3 + $0x70] sm:$0xff]  ;;  %v226_v23 = vld [vmem:[%s2260_s3 + $0xe8] sm:$0xff] }
   0x8   :  { %98 = vmatprep.subr.mxu0 %v73_v7  ;;  %v63_v20 = vld [vmem:[%s2259_s1 + $0x78] sm:$0xff]  ;;  %1158 = vmatpush3.msra.mxu1 %v212_v18  ;;  %v62_v22 = vld [vmem:[%s2259_s1 + $0x70] sm:$0xff]  ;;  %v210_v24 = vld [vmem:[%s2260_s3 + $0x68] sm:$0xff] }
   0x9   :  { %99 = vmatpush1.msra.mxu0 %v72_v8  ;;  %1159 = vmatprep.subr.mxu1 %v227_v19  ;;  %v61_v25 = vld [vmem:[%s2259_s1 + $0x68] sm:$0xff]  ;;  %v225_v26 = vld [vmem:[%s2260_s3 + $0xe0] sm:$0xff]  ;;  %v59_v29 = vld [vmem:[%s2259_s1 + $0x58] sm:$0xff] }
   0xa   :  { %100 = vmatprep.subr.mxu0 %v71_v9  ;;  %1160 = vmatpush3.msra.mxu1 %v211_v21  ;;  %v60_v27 = vld [vmem:[%s2259_s1 + $0x60] sm:$0xff]  ;;  %v224_v30 = vld [vmem:[%s2260_s3 + $0xd8] sm:$0xff]  ;;  %v58_v31 = vld [vmem:[%s2259_s1 + $0x50] sm:$0xff] }
   0xb   :  { %101 = vmatpush1.msra.mxu0 %v70_v10  ;;  %1161 = vmatprep.subr.mxu1 %v226_v23  ;;  %v209_v28 = vld [vmem:[%s2260_s3 + $0x60] sm:$0xff]  ;;  %v208_v32 = vld [vmem:[%s2260_s3 + $0x58] sm:$0xff]  ;;  %v57_v33 = vld [vmem:[%s2259_s1 + $0x48] sm:$0xff] }
   0xc   :  { %102 = vmatprep.subr.mxu0 %v69_v11  ;;  %1162 = vmatpush3.msra.mxu1 %v210_v24  ;;  %v223_v34 = vld [vmem:[%s2260_s3 + $0xd0] sm:$0xff]  ;;  %v56_v35 = vld [vmem:[%s2259_s1 + $0x40] sm:$0xff]  ;;  %v55_v36 = vld [vmem:[%s2259_s1 + $0x38] sm:$0xff] }
   0xd   :  { %103 = vmatpush1.msra.mxu0 %v68_v12  ;;  %1163 = vmatprep.subr.mxu1 %v225_v26  ;;  %v54_v37 = vld [vmem:[%s2259_s1 + $0x30] sm:$0xff]  ;;  %v53_v38 = vld [vmem:[%s2259_s1 + $0x28] sm:$0xff]  ;;  %v52_v39 = vld [vmem:[%s2259_s1 + $0x20] sm:$0xff] }
   0xe   :  { %104 = vmatprep.subr.mxu0 %v67_v13  ;;  %1164 = vmatpush3.msra.mxu1 %v209_v28  ;;  %v51_v40 = vld [vmem:[%s2259_s1 + $0x18] sm:$0xff]  ;;  %v50_v41 = vld [vmem:[%s2259_s1 + $0x10] sm:$0xff]  ;;  %v49_v42 = vld [vmem:[%s2259_s1 + $0x8] sm:$0xff] }
   0xf   :  { %105 = vmatpush1.msra.mxu0 %v66_v14  ;;  %1165 = vmatprep.subr.mxu1 %v224_v30  ;;  %v48_v43 = vld [vmem:[%s2259_s1] sm:$0xff]  ;;  %v260_v45 = vld [vmem:[%s2260_s3 + $0x1f8] sm:$0xff]  ;;  %v259_v47 = vld [vmem:[%s2260_s3 + $0x1f0] sm:$0xff] }
  0x10   :  { %106 = vmatprep.subr.mxu0 %v65_v15  ;;  %1166 = vmatpush3.msra.mxu1 %v208_v32  ;;  %v44_v44 = vld [vmem:[%s2261_s0] sm:$0xff]  ;;  %v244_v46 = vld [vmem:[%s2260_s3 + $0x178] sm:$0xff]  ;;  %v243_v48 = vld [vmem:[%s2260_s3 + $0x170] sm:$0xff] }
  0x11   :  { %107 = vmatpush1.msra.mxu0 %v64_v17  ;;  %1167 = vmatprep.subr.mxu1 %v223_v34  ;;  %v45_v49 = vld [vmem:[%s2261_s0 + $0x8] sm:$0xff]  ;;  %v257_v52 = vld [vmem:[%s2260_s3 + $0x1e0] sm:$0xff]  ;;  %v46_v54 = vld [vmem:[%s2261_s0 + $0x10] sm:$0xff] }
  0x12   :  { %108 = vmatprep.subr.mxu0 %v63_v20  ;;  %v258_v50 = vld [vmem:[%s2260_s3 + $0x1e8] sm:$0xff]  ;;  %v241_v53 = vld [vmem:[%s2260_s3 + $0x160] sm:$0xff]  ;;  %v256_v55 = vld [vmem:[%s2260_s3 + $0x1d8] sm:$0xff] }
  0x13   :  { %109 = vmatpush1.msra.mxu0 %v62_v22  ;;  %v242_v51 = vld [vmem:[%s2260_s3 + $0x168] sm:$0xff]  ;;  %v240_v56 = vld [vmem:[%s2260_s3 + $0x158] sm:$0xff]  ;;  %v255_v57 = vld [vmem:[%s2260_s3 + $0x1d0] sm:$0xff] }
  0x14   :  { %110 = vmatprep.subr.mxu0 %v61_v25  ;;  %v239_v58 = vld [vmem:[%s2260_s3 + $0x150] sm:$0xff]  ;;  %v47_v59 = vld [vmem:[%s2261_s0 + $0x18] sm:$0xff]  ;;  %v254_v61 = vld [vmem:[%s2260_s3 + $0x1c8] sm:$0xff]  ;;  %s1428_s0 = smov 64  }
  0x15   :  { %111 = vmatpush1.msra.mxu0 %v60_v27  ;;  %v207_v60 = vld [vmem:[%s2260_s3 + $0x50] sm:$0xff]  ;;  %v222_v62 = vld [vmem:[%s2260_s3 + $0xc8] sm:$0xff]  ;;  %v253_v1 = vld [vmem:[%s2260_s3 + $0x1c0] sm:$0xff] }
  0x16   :  { %112 = vmatprep.subr.mxu0 %v59_v29  ;;  %1168 = vmatpush3.msra.mxu1 %v207_v60  ;;  %v238_v63 = vld [vmem:[%s2260_s3 + $0x148] sm:$0xff]  ;;  %v221_v2 = vld [vmem:[%s2260_s3 + $0xc0] sm:$0xff]  ;;  %v252_v6 = vld [vmem:[%s2260_s3 + $0x1b8] sm:$0xff] }
  0x17   :  { %113 = vmatpush1.msra.mxu0 %v58_v31  ;;  %1169 = vmatprep.subr.mxu1 %v222_v62  ;;  %v206_v0 = vld [vmem:[%s2260_s3 + $0x48] sm:$0xff]  ;;  %v237_v4 = vld [vmem:[%s2260_s3 + $0x140] sm:$0xff]  ;;  %v220_v7 = vld [vmem:[%s2260_s3 + $0xb8] sm:$0xff] }
  0x18   :  { %114 = vmatprep.subr.mxu0 %v57_v33  ;;  %1170 = vmatpush3.msra.mxu1 %v206_v0  ;;  %v205_v5 = vld [vmem:[%s2260_s3 + $0x40] sm:$0xff]  ;;  %v236_v8 = vld [vmem:[%s2260_s3 + $0x138] sm:$0xff]  ;;  %v251_v10 = vld [vmem:[%s2260_s3 + $0x1b0] sm:$0xff] }
  0x19   :  { %115 = vmatpush1.msra.mxu0 %v56_v35  ;;  %1171 = vmatprep.subr.mxu1 %v221_v2  ;;  %v204_v9 = vld [vmem:[%s2260_s3 + $0x38] sm:$0xff]  ;;  %v219_v11 = vld [vmem:[%s2260_s3 + $0xb0] sm:$0xff]  ;;  %v250_v14 = vld [vmem:[%s2260_s3 + $0x1a8] sm:$0xff] }
  0x1a   :  { %116 = vmatprep.subr.mxu0 %v55_v36  ;;  %1172 = vmatpush3.msra.mxu1 %v205_v5  ;;  %v235_v12 = vld [vmem:[%s2260_s3 + $0x130] sm:$0xff]  ;;  %v218_v15 = vld [vmem:[%s2260_s3 + $0xa8] sm:$0xff]  ;;  %v249_v18 = vld [vmem:[%s2260_s3 + $0x1a0] sm:$0xff] }
  0x1b   :  { %117 = vmatpush1.msra.mxu0 %v54_v37  ;;  %1173 = vmatprep.subr.mxu1 %v220_v7  ;;  %v203_v13 = vld [vmem:[%s2260_s3 + $0x30] sm:$0xff]  ;;  %v234_v16 = vld [vmem:[%s2260_s3 + $0x128] sm:$0xff]  ;;  %v217_v19 = vld [vmem:[%s2260_s3 + $0xa0] sm:$0xff] }
  0x1c   :  { %118 = vmatprep.subr.mxu0 %v53_v38  ;;  %1174 = vmatpush3.msra.mxu1 %v204_v9  ;;  %v202_v17 = vld [vmem:[%s2260_s3 + $0x28] sm:$0xff]  ;;  %v233_v20 = vld [vmem:[%s2260_s3 + $0x120] sm:$0xff]  ;;  %v248_v22 = vld [vmem:[%s2260_s3 + $0x198] sm:$0xff] }
  0x1d   :  { %119 = vmatpush1.msra.mxu0 %v52_v39  ;;  %1175 = vmatprep.subr.mxu1 %v219_v11  ;;  %v201_v21 = vld [vmem:[%s2260_s3 + $0x20] sm:$0xff]  ;;  %v216_v23 = vld [vmem:[%s2260_s3 + $0x98] sm:$0xff]  ;;  %v247_v26 = vld [vmem:[%s2260_s3 + $0x190] sm:$0xff]  ;;  %v82_v39 = vlaneseq }
  0x1e   :  { %120 = vmatprep.subr.mxu0 %v51_v40  ;;  %1176 = vmatpush3.msra.mxu1 %v203_v13  ;;  %v232_v24 = vld [vmem:[%s2260_s3 + $0x118] sm:$0xff]  ;;  %v215_v27 = vld [vmem:[%s2260_s3 + $0x90] sm:$0xff]  ;;  %v246_v30 = vld [vmem:[%s2260_s3 + $0x188] sm:$0xff] }
  0x1f   :  { %121 = vmatpush1.msra.mxu0 %v50_v41  ;;  %1177 = vmatprep.subr.mxu1 %v218_v15  ;;  %v200_v25 = vld [vmem:[%s2260_s3 + $0x18] sm:$0xff]  ;;  %v231_v28 = vld [vmem:[%s2260_s3 + $0x110] sm:$0xff]  ;;  %v214_v31 = vld [vmem:[%s2260_s3 + $0x88] sm:$0xff]  ;;  %v83_v40 = vshrl.u32 %v82_v39, 7 }
  0x20   :  { %122 = vmatprep.subr.mxu0 %v49_v42  ;;  %1178 = vmatpush3.msra.mxu1 %v202_v17  ;;  %v199_v29 = vld [vmem:[%s2260_s3 + $0x10] sm:$0xff]  ;;  %v230_v32 = vld [vmem:[%s2260_s3 + $0x108] sm:$0xff]  ;;  %v245_v34 = vld [vmem:[%s2260_s3 + $0x180] sm:$0xff] }
  0x21   :  { %123 = vmatpush1.msra.mxu0 %v48_v43  ;;  %1179 = vmatprep.subr.mxu1 %v217_v19  ;;  %v198_v33 = vld [vmem:[%s2260_s3 + $0x8] sm:$0xff]  ;;  %v213_v35 = vld [vmem:[%s2260_s3 + $0x80] sm:$0xff]  ;;  %v292_v38 = vld [vmem:[%s2260_s3 + $0x2f8] sm:$0xff]  ;;  %v84_v41 = vsub.s32 0, %v83_v40 }
  0x22   :  { %157 = vmatmul.mubr.f32.vlgmr.msra.gmra.mxu0 %v44_v44  ;;  %1195 = vmatprep.subr.mxu0 %v260_v45  ;;  %v229_v36 = vld [vmem:[%s2260_s3 + $0x100] sm:$0xff]  ;;  %v88_v44 = vsub.s32 1, %v83_v40  ;;  %vm1813_vm1 = vmneg %vm298_vm0  ;;  %v276_v17 = vld [vmem:[%s2260_s3 + $0x278] sm:$0xff] }
  0x23   :  { %162 = vmatprep.mubr.f32.mxu0 %v1427_v3  ;;  %1196 = vmatpush3.msra.mxu0 %v244_v46  ;;  %v197_v37 = vld [vmem:[%s2260_s3] sm:$0xff]  ;;  %v291_v19 = vld [vmem:[%s2260_s3 + $0x2f0] sm:$0xff] }
  0x24   :  { %1197 = vmatprep.subr.mxu0 %v259_v47  ;;  %1180 = vmatpush3.msra.mxu1 %v201_v21  ;;  %v80_v42 = vld [vmem:[%s2262_s2] sm:$0x3]  ;;  %v290_v21 = vld [vmem:[%s2260_s3 + $0x2e8] sm:$0xff] }
  0x25   :  { %1198 = vmatpush3.msra.mxu0 %v243_v48  ;;  %1181 = vmatprep.subr.mxu1 %v216_v23  ;;  %v85_v46 = vrot.slane %v80_v42, %v84_v41  ;;  %v89_v47 = vrot.slane %v80_v42, %v88_v44  ;;  %v269_v40 = vld [vmem:[%s2260_s3 + $0x240] sm:$0xff]  ;;  %v284_v41 = vld [vmem:[%s2260_s3 + $0x2b8] sm:$0xff]  ;;  %v267_v44 = vld [vmem:[%s2260_s3 + $0x230] sm:$0xff] }
  0x26   :  { %163 = vmatmul.mubr.f32.gmra.mxu0 %v45_v49  ;;  %1199 = vmatprep.subr.mxu0 %v258_v50  ;;  %v268_v42 = vld [vmem:[%s2260_s3 + $0x238] sm:$0xff] }
  0x27   :  { %168 = vmatprep.mubr.f32.mxu0 %v1427_v3  ;;  %1200 = vmatpush3.msra.mxu0 %v242_v51 }
  0x28   :  { %1201 = vmatprep.subr.mxu0 %v257_v52  ;;  %1182 = vmatpush3.msra.mxu1 %v200_v25 }
  0x29   :  { %1202 = vmatpush3.msra.mxu0 %v241_v53  ;;  %1183 = vmatprep.subr.mxu1 %v215_v27  ;;  %v289_v27 = vld [vmem:[%s2260_s3 + $0x2e0] sm:$0xff] }
  0x2a   :  { %169 = vmatmul.mubr.f32.gmra.mxu0 %v46_v54  ;;  %1203 = vmatprep.subr.mxu0 %v256_v55 }
  0x2b   :  { %174 = vmatprep.mubr.f32.mxu0 %v1427_v3  ;;  %1204 = vmatpush3.msra.mxu0 %v240_v56 }
  0x2c   :  { %1205 = vmatprep.subr.mxu0 %v255_v57  ;;  %1184 = vmatpush3.msra.mxu1 %v199_v29 }
  0x2d   :  { %1206 = vmatpush3.msra.mxu0 %v239_v58  ;;  %1185 = vmatprep.subr.mxu1 %v214_v31  ;;  %v288_v31 = vld [vmem:[%s2260_s3 + $0x2d8] sm:$0xff] }
  0x2e   :  { %175 = vmatmul.mubr.f32.gmra.mxu0 %v47_v59  ;;  %1207 = vmatprep.subr.mxu0 %v254_v61 }
  0x2f   :  { %1208 = vmatpush3.msra.mxu0 %v238_v63  ;;  %1186 = vmatpush3.msra.mxu1 %v198_v33  ;;  %v272_v33 = vld [vmem:[%s2260_s3 + $0x258] sm:$0xff] }
  0x30   :  { %1209 = vmatprep.subr.mxu0 %v253_v1  ;;  %1187 = vmatprep.subr.mxu1 %v213_v35  ;;  %v271_v35 = vld [vmem:[%s2260_s3 + $0x250] sm:$0xff] }
  0x31   :  { %1210 = vmatpush3.msra.mxu0 %v237_v4  ;;  %1188 = vmatpush3.msra.mxu1 %v197_v37  ;;  %v270_v37 = vld [vmem:[%s2260_s3 + $0x248] sm:$0xff] }
  0x32   :  { %1211 = vmatprep.subr.mxu0 %v252_v6  ;;  %1233 = vmatprep.subr.mxu1 %v292_v38  ;;  %v285_v38 = vld [vmem:[%s2260_s3 + $0x2c0] sm:$0xff] }
  0x33   :  { %1212 = vmatpush3.msra.mxu0 %v236_v8 }
  0x34   :  { %1213 = vmatprep.subr.mxu0 %v251_v10 }
  0x35   :  { %1214 = vmatpush3.msra.mxu0 %v235_v12  ;;  %v792_v12 = vld [vmem:[%s2265_s7 + $0x70] sm:$0xff] }
  0x36   :  { %1215 = vmatprep.subr.mxu0 %v250_v14 }
  0x37   :  { %1216 = vmatpush3.msra.mxu0 %v234_v16 }
  0x38   :  { %1217 = vmatprep.subr.mxu0 %v249_v18 }
  0x39   :  { %1218 = vmatpush3.msra.mxu0 %v233_v20  ;;  %v275_v20 = vld [vmem:[%s2260_s3 + $0x270] sm:$0xff] }
  0x3a   :  { %1219 = vmatprep.subr.mxu0 %v248_v22 }
  0x3b   :  { %1220 = vmatpush3.msra.mxu0 %v232_v24  ;;  %v274_v24 = vld [vmem:[%s2260_s3 + $0x268] sm:$0xff] }
  0x3c   :  { %1221 = vmatprep.subr.mxu0 %v247_v26 }
  0x3d   :  { %1222 = vmatpush3.msra.mxu0 %v231_v28  ;;  %v273_v28 = vld [vmem:[%s2260_s3 + $0x260] sm:$0xff] }
  0x3e   :  { %1223 = vmatprep.subr.mxu0 %v246_v30 }
  0x3f   :  { %1224 = vmatpush3.msra.mxu0 %v230_v32 }
  0x40   :  { %1225 = vmatprep.subr.mxu0 %v245_v34  ;;  %v287_v34 = vld [vmem:[%s2260_s3 + $0x2d0] sm:$0xff] }
  0x41   :  { %1226 = vmatpush3.msra.mxu0 %v229_v36  ;;  %v286_v36 = vld [vmem:[%s2260_s3 + $0x2c8] sm:$0xff] }
  0xe2   :  { %v158_v43 = vpop.f32.mrf.mxu0 }
  0xe3   :  { %v159_v50 = vadd.f32 %v158_v43, %v85_v46  ;;  %v283_v43 = vld [vmem:[%s2260_s3 + $0x2b0] sm:$0xff] }
  0xe4   :  { %v160_v45 = vpop.f32.mrf.mxu0 }
  0xe5   :  { %v161_v51 = vadd.f32 %v160_v45, %v89_v47  ;;  %v181_v55 = vmax.f32 %v159_v50, 0.0  ;;  %v282_v45 = vld [vmem:[%s2260_s3 + $0x2a8] sm:$0xff]  ;;  %v264_v50 = vld [vmem:[%s2260_s3 + $0x218] sm:$0xff] }
  0xe6   :  { %v164_v48 = vpop.f32.mrf.mxu0 }
  0xe7   :  { %v165_v56 = vadd.f32 %v164_v48, %v85_v46  ;;  %v182_v59 = vmax.f32 %v161_v51, 0.0  ;;  %v265_v48 = vld [vmem:[%s2260_s3 + $0x220] sm:$0xff]  ;;  %v279_v51 = vld [vmem:[%s2260_s3 + $0x290] sm:$0xff] }
  0xe8   :  { %v166_v49 = vpop.f32.mrf.mxu0 }
  0xe9   :  { %v167_v61 = vadd.f32 %v166_v49, %v89_v47  ;;  %v183_v2 = vmax.f32 %v165_v56, 0.0  ;;  %v280_v49 = vld [vmem:[%s2260_s3 + $0x298] sm:$0xff]  ;;  %v277_v56 = vld [vmem:[%s2260_s3 + $0x280] sm:$0xff] }
  0xea   :  { %v170_v52 = vpop.f32.mrf.mxu0 }
  0xeb   :  { %v171_v53 = vadd.f32 %v170_v52, %v85_v46  ;;  %v184_v8 = vmax.f32 %v167_v61, 0.0  ;;  %v263_v52 = vld [vmem:[%s2260_s3 + $0x210] sm:$0xff]  ;;  %v572_v61 = vld [vmem:[%s2263_s5 + $0x78] sm:$0xff] }
  0xec   :  { %v172_v54 = vpop.f32.mrf.mxu0 }
  0xed   :  { %v185_v57 = vmax.f32 %v171_v53, 0.0  ;;  %v173_v58 = vadd.f32 %v172_v54, %v89_v47  ;;  %v278_v53 = vld [vmem:[%s2260_s3 + $0x288] sm:$0xff] }
  0xee   :  { %v176_v60 = vpop.f32.mrf.mxu0  ;;  %v262_v54 = vld [vmem:[%s2260_s3 + $0x208] sm:$0xff] }
  0xef   :  { %v189_v62 = vadd.f32 %v185_v57, %v181_v55  ;;  %v186_v63 = vmax.f32 %v173_v58, 0.0  ;;  %v177_v0 = vadd.f32 %v176_v60, %v85_v46  ;;  %v266_v46 = vld [vmem:[%s2260_s3 + $0x228] sm:$0xff]  ;;  %v261_v57 = vld [vmem:[%s2260_s3 + $0x200] sm:$0xff]  ;;  %v588_v60 = vld [vmem:[%s2263_s5 + $0xf8] sm:$0xff] }
  0xf0   :  { %v178_v1 = vpop.f32.mrf.mxu0  ;;  %1271 = vmatprep.subr.mxu0 %v588_v60 }
  0xf1   :  { %v190_v4 = vadd.f32 %v186_v63, %v182_v59  ;;  %v187_v5 = vmax.f32 %v177_v0, 0.0  ;;  %v179_v6 = vadd.f32 %v178_v1, %v89_v47  ;;  %v1810_v7 = vmul.f32 0.5, %v189_v62  ;;  %v281_v47 = vld [vmem:[%s2260_s3 + $0x2a0] sm:$0xff]  ;;  %v587_v62 = vld [vmem:[%s2263_s5 + $0xf0] sm:$0xff]  ;;  %v586_v0 = vld [vmem:[%s2263_s5 + $0xe8] sm:$0xff] }
  0xf2   :  { %v571_v63 = vld [vmem:[%s2263_s5 + $0x70] sm:$0xff]  ;;  %v570_v1 = vld [vmem:[%s2263_s5 + $0x68] sm:$0xff] }
  0xf3   :  { %v194_v9 = vmul.f32 0.5, %v190_v4  ;;  %v191_v10 = vadd.f32 %v187_v5, %v183_v2  ;;  %v188_v11 = vmax.f32 %v179_v6, 0.0  ;;  %v299_v16 = vrot.slane %v1810_v7, 7  ;;  %v604_v2 = vld [vmem:[%s2263_s5 + $0x178] sm:$0xff]  ;;  %v585_v4 = vld [vmem:[%s2263_s5 + $0xe0] sm:$0xff]  ;;  %v603_v5 = vld [vmem:[%s2263_s5 + $0x170] sm:$0xff] }
  0xf4   :  { %v312_v58 = vrot.slane %v1810_v7, 1  ;;  %v569_v6 = vld [vmem:[%s2263_s5 + $0x60] sm:$0xff] }
  0xf5   :  { %v1817_v13 = vmul.f32 0.5, %v191_v10  ;;  %v192_v14 = vadd.f32 %v188_v11, %v184_v8  ;;  %469 = vmatprep.mubr.f32.mxu0 %v194_v9  ;;  %v300_v15 = vrot.slane %v194_v9, 7  ;;  %v315_v29 = vrot.slane %v194_v9, 1  ;;  %v584_v8 = vld [vmem:[%s2263_s5 + $0xd8] sm:$0xff]  ;;  %v601_v10 = vld [vmem:[%s2263_s5 + $0x160] sm:$0xff]  ;;  %v583_v11 = vld [vmem:[%s2263_s5 + $0xd0] sm:$0xff] }
  0xf6   :  { %470 = vmatmul.mubr.f32.vlgmr.msra.gmra.mxu0 %v1810_v7  ;;  %v602_v7 = vld [vmem:[%s2263_s5 + $0x168] sm:$0xff]  ;;  %v568_v9 = vld [vmem:[%s2263_s5 + $0x58] sm:$0xff] }
  0xf7   :  { %v1824_v18 = vmul.f32 0.5, %v192_v14  ;;  %1136 = vmatprep.mubr.msk.f32.mxu1 %vm1813_vm1, %v300_v15  ;;  %v301_v23 = vrot.slane %v1817_v13, 7  ;;  %v313_v55 = vrot.slane %v1817_v13, 1  ;;  %1272 = vmatpush3.msra.mxu0 %v572_v61  ;;  %v600_v14 = vld [vmem:[%s2263_s5 + $0x158] sm:$0xff] }
  0xf8   :  { %1138 = vmatmul.mubr.msk.f32.vlgmr.msra.gmra.mxu1 %vm1813_vm1, %v299_v16  ;;  %1273 = vmatprep.subr.mxu0 %v587_v62 }
  0xf9   :  { %1234 = vmatpush3.msra.mxu1 %v276_v17  ;;  %474 = vmatprep.mubr.f32.mxu0 %v1824_v18  ;;  %v303_v22 = vrot.slane %v1824_v18, 7  ;;  %v316_v25 = vrot.slane %v1824_v18, 1  ;;  %v302_v30 = vsel %vm298_vm0, %v299_v16, %v301_v23  ;;  %v314_v59 = vsel %vm311_vm2, %v312_v58, %v313_v55  ;;  %v566_v16 = vld [vmem:[%s2263_s5 + $0x48] sm:$0xff]  ;;  %v599_v17 = vld [vmem:[%s2263_s5 + $0x150] sm:$0xff]  ;;  %v581_v18 = vld [vmem:[%s2263_s5 + $0xc0] sm:$0xff] }
  0xfa   :  { %1235 = vmatprep.subr.mxu1 %v291_v19  ;;  %475 = vmatmul.mubr.f32.gmra.mxu0 %v1817_v13  ;;  %v567_v13 = vld [vmem:[%s2263_s5 + $0x50] sm:$0xff]  ;;  %v565_v19 = vld [vmem:[%s2263_s5 + $0x40] sm:$0xff] }
  0xfb   :  { %1236 = vmatpush3.msra.mxu1 %v275_v20  ;;  %v304_v26 = vsel %vm298_vm0, %v300_v15, %v303_v22  ;;  %v317_v32 = vsel %vm311_vm2, %v315_v29, %v316_v25  ;;  %1274 = vmatpush3.msra.mxu0 %v571_v63  ;;  %v582_v15 = vld [vmem:[%s2263_s5 + $0xc8] sm:$0xff]  ;;  %v564_v22 = vld [vmem:[%s2263_s5 + $0x38] sm:$0xff]  ;;  %v597_v23 = vld [vmem:[%s2263_s5 + $0x140] sm:$0xff] }
  0xfc   :  { %1237 = vmatprep.subr.mxu1 %v290_v21  ;;  %399 = vmatprep.mubr.f32.mxu1 %v304_v26  ;;  %v598_v20 = vld [vmem:[%s2263_s5 + $0x148] sm:$0xff]  ;;  %v580_v21 = vld [vmem:[%s2263_s5 + $0xb8] sm:$0xff] }
  0xfd   :  { %1238 = vmatpush3.msra.mxu1 %v274_v24  ;;  %1275 = vmatprep.subr.mxu0 %v586_v0  ;;  %v579_v24 = vld [vmem:[%s2263_s5 + $0xb0] sm:$0xff]  ;;  %v578_v26 = vld [vmem:[%s2263_s5 + $0xa8] sm:$0xff]  ;;  %v596_v29 = vld [vmem:[%s2263_s5 + $0x138] sm:$0xff] }
  0xfe   :  { %400 = vmatmul.mubr.f32.gmra.mxu1 %v302_v30  ;;  %1239 = vmatprep.subr.mxu1 %v289_v27  ;;  %v562_v27 = vld [vmem:[%s2263_s5 + $0x28] sm:$0xff]  ;;  %v561_v30 = vld [vmem:[%s2263_s5 + $0x20] sm:$0xff] }
  0xff   :  { %1240 = vmatpush3.msra.mxu1 %v273_v28  ;;  %544 = vmatprep.mubr.f32.mxu1 %v317_v32  ;;  %v577_v28 = vld [vmem:[%s2263_s5 + $0xa0] sm:$0xff]  ;;  %v595_v32 = vld [vmem:[%s2263_s5 + $0x130] sm:$0xff] }
 0x100   :  { %1241 = vmatprep.subr.mxu1 %v288_v31  ;;  %1276 = vmatpush3.msra.mxu0 %v570_v1  ;;  %v576_v31 = vld [vmem:[%s2263_s5 + $0x98] sm:$0xff] }
 0x101   :  { %1242 = vmatpush3.msra.mxu1 %v272_v33  ;;  %1277 = vmatprep.subr.mxu0 %v585_v4  ;;  %v560_v33 = vld [vmem:[%s2263_s5 + $0x18] sm:$0xff] }
 0x102   :  { %1243 = vmatprep.subr.mxu1 %v287_v34  ;;  %1278 = vmatpush3.msra.mxu0 %v569_v6  ;;  %v575_v34 = vld [vmem:[%s2263_s5 + $0x90] sm:$0xff] }
 0x103   :  { %1244 = vmatpush3.msra.mxu1 %v271_v35  ;;  %1279 = vmatprep.subr.mxu0 %v584_v8  ;;  %v594_v35 = vld [vmem:[%s2263_s5 + $0x128] sm:$0xff] }
 0x104   :  { %1245 = vmatprep.subr.mxu1 %v286_v36  ;;  %1280 = vmatpush3.msra.mxu0 %v568_v9  ;;  %v559_v36 = vld [vmem:[%s2263_s5 + $0x10] sm:$0xff] }
 0x105   :  { %1246 = vmatpush3.msra.mxu1 %v270_v37  ;;  %1281 = vmatprep.subr.mxu0 %v583_v11  ;;  %v574_v37 = vld [vmem:[%s2263_s5 + $0x88] sm:$0xff] }
 0x106   :  { %1247 = vmatprep.subr.mxu1 %v285_v38  ;;  %1282 = vmatpush3.msra.mxu0 %v567_v13  ;;  %v593_v38 = vld [vmem:[%s2263_s5 + $0x120] sm:$0xff] }
 0x107   :  { %1248 = vmatpush3.msra.mxu1 %v269_v40  ;;  %1283 = vmatprep.subr.mxu0 %v582_v15  ;;  %v558_v40 = vld [vmem:[%s2263_s5 + $0x8] sm:$0xff] }
 0x108   :  { %1249 = vmatprep.subr.mxu1 %v284_v41  ;;  %1284 = vmatpush3.msra.mxu0 %v566_v16  ;;  %v573_v41 = vld [vmem:[%s2263_s5 + $0x80] sm:$0xff] }
 0x109   :  { %1250 = vmatpush3.msra.mxu1 %v268_v42  ;;  %1285 = vmatprep.subr.mxu0 %v581_v18  ;;  %v592_v42 = vld [vmem:[%s2263_s5 + $0x118] sm:$0xff] }
 0x10a   :  { %1251 = vmatprep.subr.mxu1 %v283_v43  ;;  %1286 = vmatpush3.msra.mxu0 %v565_v19  ;;  %v557_v43 = vld [vmem:[%s2263_s5] sm:$0xff]  ;;  %v793_v18 = vld [vmem:[%s2265_s7 + $0x78] sm:$0xff]  ;;  %v791_v19 = vld [vmem:[%s2265_s7 + $0x68] sm:$0xff] }
 0x10b   :  { %1252 = vmatpush3.msra.mxu1 %v267_v44  ;;  %1287 = vmatprep.subr.mxu0 %v580_v21  ;;  %v591_v44 = vld [vmem:[%s2263_s5 + $0x110] sm:$0xff]  ;;  %v789_v21 = vld [vmem:[%s2265_s7 + $0x58] sm:$0xff] }
 0x10c   :  { %1253 = vmatprep.subr.mxu1 %v282_v45  ;;  %1288 = vmatpush3.msra.mxu0 %v564_v22  ;;  %v590_v45 = vld [vmem:[%s2263_s5 + $0x108] sm:$0xff]  ;;  %v788_v22 = vld [vmem:[%s2265_s7 + $0x50] sm:$0xff] }
 0x10d   :  { %1254 = vmatpush3.msra.mxu1 %v266_v46  ;;  %1289 = vmatprep.subr.mxu0 %v579_v24  ;;  %v589_v46 = vld [vmem:[%s2263_s5 + $0x100] sm:$0xff] }
 0x10e   :  { %1255 = vmatprep.subr.mxu1 %v281_v47  ;;  %v786_v24 = vld [vmem:[%s2265_s7 + $0x40] sm:$0xff] }
 0x10f   :  { %1256 = vmatpush3.msra.mxu1 %v265_v48 }
 0x110   :  { %1257 = vmatprep.subr.mxu1 %v280_v49 }
 0x111   :  { %1258 = vmatpush3.msra.mxu1 %v264_v50 }
 0x112   :  { %1259 = vmatprep.subr.mxu1 %v279_v51 }
 0x113   :  { %1260 = vmatpush3.msra.mxu1 %v263_v52 }
 0x114   :  { %1261 = vmatprep.subr.mxu1 %v278_v53  ;;  %v1134_v53 = vld [vmem:[%s2264_s4] ss:$0 sm:$0xff] }
 0x115   :  { %1262 = vmatpush3.msra.mxu1 %v262_v54 }
 0x116   :  { %1263 = vmatprep.subr.mxu1 %v277_v56 }
 0x117   :  { %1264 = vmatpush3.msra.mxu1 %v261_v57 }
 0x118   :  { %545 = vmatmul.mubr.f32.vlgmr.msra.gmra.mxu1 %v314_v59  ;;  %1346 = vmatprep.subr.mxu1 %v604_v2 }
 0x119   :  { %1139 = vmatprep.mubr.msk.f32.mxu1 %vm311_vm2, %v316_v25  ;;  %1347 = vmatpush3.msra.mxu1 %v604_v2  ;;  %v563_v25 = vld [vmem:[%s2263_s5 + $0x30] sm:$0xff] }
 0x11a   :  { %1348 = vmatprep.subr.mxu1 %v603_v5  ;;  %1290 = vmatpush3.msra.mxu0 %v563_v25  ;;  %v785_v25 = vld [vmem:[%s2265_s7 + $0x38] sm:$0xff] }
 0x11b   :  { %1349 = vmatpush3.msra.mxu1 %v603_v5  ;;  %1291 = vmatprep.subr.mxu0 %v578_v26  ;;  %v784_v26 = vld [vmem:[%s2265_s7 + $0x30] sm:$0xff] }
 0x11c   :  { %1140 = vmatmul.mubr.msk.f32.gmra.mxu1 %vm311_vm2, %v313_v55  ;;  %1350 = vmatprep.subr.mxu1 %v602_v7 }
 0x11d   :  { %1351 = vmatpush3.msra.mxu1 %v602_v7  ;;  %1292 = vmatpush3.msra.mxu0 %v562_v27  ;;  %v783_v27 = vld [vmem:[%s2265_s7 + $0x28] sm:$0xff] }
 0x11e   :  { %1352 = vmatprep.subr.mxu1 %v601_v10  ;;  %1293 = vmatprep.subr.mxu0 %v577_v28  ;;  %v782_v28 = vld [vmem:[%s2265_s7 + $0x20] sm:$0xff] }
 0x11f   :  { %1353 = vmatpush3.msra.mxu1 %v601_v10  ;;  %1294 = vmatpush3.msra.mxu0 %v561_v30  ;;  %v780_v30 = vld [vmem:[%s2265_s7 + $0x10] sm:$0xff] }
 0x120   :  { %1354 = vmatprep.subr.mxu1 %v600_v14  ;;  %1295 = vmatprep.subr.mxu0 %v576_v31  ;;  %v779_v31 = vld [vmem:[%s2265_s7 + $0x8] sm:$0xff] }
 0x121   :  { %1355 = vmatpush3.msra.mxu1 %v600_v14  ;;  %1296 = vmatpush3.msra.mxu0 %v560_v33  ;;  %v801_v33 = vld [vmem:[%s2265_s7 + $0xb8] sm:$0xff] }
 0x122   :  { %1356 = vmatprep.subr.mxu1 %v599_v17  ;;  %1297 = vmatprep.subr.mxu0 %v575_v34  ;;  %v800_v34 = vld [vmem:[%s2265_s7 + $0xb0] sm:$0xff] }
 0x123   :  { %1357 = vmatpush3.msra.mxu1 %v599_v17  ;;  %1298 = vmatpush3.msra.mxu0 %v559_v36  ;;  %v798_v36 = vld [vmem:[%s2265_s7 + $0xa0] sm:$0xff] }
 0x124   :  { %1358 = vmatprep.subr.mxu1 %v598_v20  ;;  %1299 = vmatprep.subr.mxu0 %v574_v37  ;;  %v797_v37 = vld [vmem:[%s2265_s7 + $0x98] sm:$0xff] }
 0x125   :  { %1359 = vmatpush3.msra.mxu1 %v598_v20  ;;  %1300 = vmatpush3.msra.mxu0 %v558_v40  ;;  %v790_v20 = vld [vmem:[%s2265_s7 + $0x60] sm:$0xff]  ;;  %v795_v40 = vld [vmem:[%s2265_s7 + $0x88] sm:$0xff] }
 0x126   :  { %1360 = vmatprep.subr.mxu1 %v597_v23  ;;  %1301 = vmatprep.subr.mxu0 %v573_v41  ;;  %v794_v41 = vld [vmem:[%s2265_s7 + $0x80] sm:$0xff] }
 0x127   :  { %1361 = vmatpush3.msra.mxu1 %v597_v23  ;;  %1302 = vmatpush3.msra.mxu0 %v557_v43  ;;  %v787_v23 = vld [vmem:[%s2265_s7 + $0x48] sm:$0xff] }
 0x128   :  { %1362 = vmatprep.subr.mxu1 %v596_v29  ;;  %836 = vmatprep.subr.mxu0 %v1427_v3 }
 0x129   :  { %1363 = vmatpush3.msra.mxu1 %v596_v29  ;;  %v781_v29 = vld [vmem:[%s2265_s7 + $0x18] sm:$0xff] }
 0x12a   :  { %1364 = vmatprep.subr.mxu1 %v595_v32 }
 0x12b   :  { %1365 = vmatpush3.msra.mxu1 %v595_v32  ;;  %v778_v32 = vld [vmem:[%s2265_s7] sm:$0xff] }
 0x12c   :  { %1366 = vmatprep.subr.mxu1 %v594_v35 }
 0x12d   :  { %1367 = vmatpush3.msra.mxu1 %v594_v35  ;;  %v799_v35 = vld [vmem:[%s2265_s7 + $0xa8] sm:$0xff] }
 0x12e   :  { %1368 = vmatprep.subr.mxu1 %v593_v38 }
 0x12f   :  { %1369 = vmatpush3.msra.mxu1 %v593_v38  ;;  %v796_v38 = vld [vmem:[%s2265_s7 + $0x90] sm:$0xff] }
 0x130   :  { %1370 = vmatprep.subr.mxu1 %v592_v42 }
 0x131   :  { %1371 = vmatpush3.msra.mxu1 %v592_v42 }
 0x132   :  { %1372 = vmatprep.subr.mxu1 %v591_v44 }
 0x133   :  { %1373 = vmatpush3.msra.mxu1 %v591_v44 }
 0x134   :  { %1374 = vmatprep.subr.mxu1 %v590_v45 }
 0x135   :  { %1375 = vmatpush3.msra.mxu1 %v590_v45  ;;  %v1141_v45 = vld [vmem:[%s2266_s6] ss:$0 sm:$0xff] }
 0x136   :  { %1376 = vmatprep.subr.mxu1 %v589_v46 }
 0x137   :  { %1377 = vmatpush3.msra.mxu1 %v589_v46 }
 0x1b6   :  { %v1227_v49 = vpop.f32.mrf.mxu0 }
 0x1b8   :  { %v1189_v47 = vpop.f32.mrf.mxu1  ;;  %v1228_v51 = vpop.f32.mrf.mxu0 }
 0x1b9   :  { %v1229_v59 = vadd.f32 %v1228_v51, %v1227_v49 }
 0x1ba   :  { %v1190_v48 = vpop.f32.mrf.mxu1  ;;  %v1230_v55 = vpop.f32.mrf.mxu0 }
 0x1bb   :  { %v1191_v52 = vadd.f32 %v1190_v48, %v1189_v47 }
 0x1bc   :  { %v1231_v60 = vpop.f32.mrf.mxu0 }
 0x1bd   :  { %v397_v56 = vadd.f32 %v1191_v52, %v1134_v53  ;;  %v1232_v2 = vadd.f32 %v1231_v60, %v1230_v55 }
 0x1be   :  { %v1192_v50 = vpop.f32.mrf.mxu1 }
 0x1bf   :  { %v472_v63 = vadd.f32 %v1229_v59, %v397_v56 }
 0x1c0   :  { %v1193_v54 = vpop.f32.mrf.mxu1 }
 0x1c1   :  { %v1194_v57 = vadd.f32 %v1193_v54, %v1192_v50 }
 0x1c3   :  { %v402_v62 = vadd.f32 %v1194_v57, %v1134_v53 }
 0x1c5   :  { %v477_v7 = vadd.f32 %v1232_v2, %v402_v62 }
 0x1d8   :  { %v1265_v58 = vpop.f32.mrf.mxu1 }
 0x1da   :  { %v1266_v61 = vpop.f32.mrf.mxu1 }
 0x1db   :  { %v1267_v0 = vadd.f32 %v1266_v61, %v1265_v58 }
 0x1dc   :  { %v1268_v1 = vpop.f32.mrf.mxu1 }
 0x1dd   :  { %v547_v4 = vadd.f32 %v1267_v0, %v472_v63 }
 0x1de   :  { %v1269_v5 = vpop.f32.mrf.mxu1 }
 0x1df   :  { %v555_v6 = vmax.f32 %v547_v4, 0.0  ;;  %v1270_v8 = vadd.f32 %v1269_v5, %v1268_v1  ;;  %v914_v5 = vld [vmem:[%s2267_s9 + $0x8] sm:$0xff] }
 0x1e0   :  { %1381 = vmatprep.subr.mxu1 %v914_v5 }
 0x1e1   :  { %v608_v9 = vrot.slane %v555_v6, 7  ;;  %v552_v10 = vadd.f32 %v1270_v8, %v477_v7  ;;  %690 = vmatprep.mubr.f32.mxu0 %v555_v6  ;;  %v614_v14 = vrot.slane %v555_v6, 1  ;;  %v913_v6 = vld [vmem:[%s2267_s9] sm:$0xff] }
 0x1e2   :  { %v1016_v7 = vld [vmem:[%s2268_s11 + $0x60] sm:$0xf] }
 0x1e3   :  { %v556_v11 = vmax.f32 %v552_v10, 0.0  ;;  %1143 = vmatmul.mubr.msk.f32.vlgmr.msra.gmra.mxu0 %vm1813_vm1, %v608_v9  ;;  %v1145_v8 = vld [vmem:[%s2269_s8] ss:$0 sm:$0xff] }
 0x1e4   :  { %837 = vmatpush1.msra.mxu0 %v793_v18  ;;  %v1015_v18 = vld [vmem:[%s2268_s11 + $0x58] sm:$0xff] }
 0x1e5   :  { %695 = vmatprep.mubr.f32.mxu0 %v556_v11  ;;  %v609_v13 = vrot.slane %v556_v11, 7  ;;  %v615_v15 = vrot.slane %v556_v11, 1  ;;  %838 = vmatprep.subr.mxu0 %v1427_v3 }
 0x1e6   :  { %839 = vmatpush1.msra.mxu0 %v792_v12  ;;  %v1014_v12 = vld [vmem:[%s2268_s11 + $0x50] sm:$0xff] }
 0x1e7   :  { %v610_v16 = vsel %vm298_vm0, %v608_v9, %v609_v13  ;;  %v616_v17 = vsel %vm311_vm2, %v614_v14, %v615_v15  ;;  %840 = vmatprep.subr.mxu0 %v1427_v3 }
 0x1e8   :  { %696 = vmatmul.mubr.f32.gmra.mxu0 %v610_v16  ;;  %1378 = vmatprep.mubr.f32.mxu1 %v616_v17 }
 0x1e9   :  { %1379 = vmatmul.mubr.msk.f32.vlgmr.msra.gmra.mxu1 %vm311_vm2, %v615_v15  ;;  %841 = vmatpush1.msra.mxu0 %v791_v19  ;;  %v1013_v19 = vld [vmem:[%s2268_s11 + $0x48] sm:$0xff] }
 0x1ea   :  { %842 = vmatprep.subr.mxu0 %v1427_v3  ;;  %1382 = vmatpush3.msra.mxu1 %v914_v5 }
 0x1eb   :  { %843 = vmatpush1.msra.mxu0 %v790_v20  ;;  %1383 = vmatprep.subr.mxu1 %v913_v6  ;;  %v1012_v20 = vld [vmem:[%s2268_s11 + $0x40] sm:$0xff] }
 0x1ec   :  { %844 = vmatprep.subr.mxu0 %v1427_v3  ;;  %1384 = vmatpush3.msra.mxu1 %v913_v6 }
 0x1ed   :  { %845 = vmatpush1.msra.mxu0 %v789_v21  ;;  %1388 = vmatprep.subr.msk.mxu1 %vm1031_vm4, %v1016_v7  ;;  %v1011_v21 = vld [vmem:[%s2268_s11 + $0x38] sm:$0xff] }
 0x1ee   :  { %846 = vmatprep.subr.mxu0 %v1427_v3 }
 0x1ef   :  { %847 = vmatpush1.msra.mxu0 %v788_v22  ;;  %v1010_v22 = vld [vmem:[%s2268_s11 + $0x30] sm:$0xff] }
 0x1f0   :  { %848 = vmatprep.subr.mxu0 %v1427_v3 }
 0x1f1   :  { %849 = vmatpush1.msra.mxu0 %v787_v23  ;;  %v1009_v23 = vld [vmem:[%s2268_s11 + $0x28] sm:$0xff] }
 0x1f2   :  { %850 = vmatprep.subr.mxu0 %v1427_v3 }
 0x1f3   :  { %851 = vmatpush1.msra.mxu0 %v786_v24  ;;  %v1008_v24 = vld [vmem:[%s2268_s11 + $0x20] sm:$0xff] }
 0x1f4   :  { %852 = vmatprep.subr.mxu0 %v1427_v3 }
 0x1f5   :  { %853 = vmatpush1.msra.mxu0 %v785_v25  ;;  %v1007_v25 = vld [vmem:[%s2268_s11 + $0x18] sm:$0xff] }
 0x1f6   :  { %854 = vmatprep.subr.mxu0 %v1427_v3 }
 0x1f7   :  { %855 = vmatpush1.msra.mxu0 %v784_v26  ;;  %v1006_v26 = vld [vmem:[%s2268_s11 + $0x10] sm:$0xff] }
 0x1f8   :  { %856 = vmatprep.subr.mxu0 %v1427_v3 }
 0x1f9   :  { %857 = vmatpush1.msra.mxu0 %v783_v27  ;;  %v1005_v27 = vld [vmem:[%s2268_s11 + $0x8] sm:$0xff] }
 0x1fa   :  { %858 = vmatprep.subr.mxu0 %v1427_v3 }
 0x1fb   :  { %859 = vmatpush1.msra.mxu0 %v782_v28  ;;  %v1004_v28 = vld [vmem:[%s2268_s11] sm:$0xff] }
 0x1fc   :  { %860 = vmatprep.subr.mxu0 %v1427_v3 }
 0x1fd   :  { %861 = vmatpush1.msra.mxu0 %v781_v29 }
 0x1fe   :  { %862 = vmatprep.subr.mxu0 %v1427_v3 }
 0x1ff   :  { %863 = vmatpush1.msra.mxu0 %v780_v30  ;;  %v1148_v30 = vld [vmem:[%s2270_s10] ss:$0 sm:$0xff] }
 0x200   :  { %864 = vmatprep.subr.mxu0 %v1427_v3 }
 0x201   :  { %865 = vmatpush1.msra.mxu0 %v779_v31 }
 0x202   :  { %866 = vmatprep.subr.mxu0 %v1427_v3 }
 0x203   :  { %867 = vmatpush1.msra.mxu0 %v778_v32 }
 0x204   :  { %884 = vmatprep.subr.mxu0 %v1427_v3 }
 0x205   :  { %885 = vmatpush2.msra.mxu0 %v801_v33 }
 0x206   :  { %886 = vmatprep.subr.mxu0 %v1427_v3 }
 0x207   :  { %887 = vmatpush2.msra.mxu0 %v800_v34  ;;  %v1151_v34 = vld [vmem:[%s2271_s12] ss:$0 sm:$0xff] }
 0x208   :  { %888 = vmatprep.subr.mxu0 %v1427_v3 }
 0x209   :  { %889 = vmatpush2.msra.mxu0 %v799_v35 }
 0x20a   :  { %890 = vmatprep.subr.mxu0 %v1427_v3 }
 0x20b   :  { %891 = vmatpush2.msra.mxu0 %v798_v36 }
 0x20c   :  { %892 = vmatprep.subr.mxu0 %v1427_v3 }
 0x20d   :  { %893 = vmatpush2.msra.mxu0 %v797_v37 }
 0x20e   :  { %894 = vmatprep.subr.mxu0 %v1427_v3 }
 0x20f   :  { %895 = vmatpush2.msra.mxu0 %v796_v38 }
 0x210   :  { %896 = vmatprep.subr.mxu0 %v1427_v3 }
 0x211   :  { %897 = vmatpush2.msra.mxu0 %v795_v40 }
 0x212   :  { %898 = vmatprep.subr.mxu0 %v1427_v3 }
 0x213   :  { %899 = vmatpush2.msra.mxu0 %v794_v41 }
 0x2a3   :  { %v1303_v42 = vpop.f32.mrf.mxu0 }
 0x2a5   :  { %v1304_v43 = vpop.f32.mrf.mxu0 }
 0x2a6   :  { %v1305_v44 = vadd.f32 %v1304_v43, %v1303_v42 }
 0x2a8   :  { %v1306_v46 = vpop.f32.mrf.mxu0  ;;  %v693_v49 = vadd.f32 %v1305_v44, %v1141_v45 }
 0x2a9   :  { %v1380_v47 = vpop.f32.mrf.mxu1 }
 0x2aa   :  { %v1307_v48 = vpop.f32.mrf.mxu0 }
 0x2ab   :  { %v1308_v50 = vadd.f32 %v1307_v48, %v1306_v46  ;;  %v767_v51 = vpop.f32.mrf.mxu1  ;;  %v1111_v46 = vand.u32 127, %v82_v39 }
 0x2ac   :  { %v768_v52 = vadd.f32 %v767_v51, %v693_v49 }
 0x2ad   :  { %v698_v3 = vadd.f32 %v1308_v50, %v1141_v45  ;;  %vm1112_vm7 = vcmp.eq.s32.totalorder %v1111_v46, 0 }
 0x2ae   :  { %v776_v53 = vmax.f32 %v768_v52, 0.0 }
 0x2af   :  { %v773_v54 = vadd.f32 %v1380_v47, %v698_v3 }
 0x2b0   :  { %816 = vrot.lane.b32.xlu0 %v776_v53, %s1428_s0  ;;  %v805_v56 = vrot.slane %v776_v53, 7  ;;  %v811_v57 = vrot.slane %v776_v53, 1 }
 0x2b1   :  { %v777_v55 = vmax.f32 %v773_v54, 0.0 }
 0x2b2   :  { %v810_v63 = vsel %vm298_vm0, 0.0, %v805_v56 }
 0x2b3   :  { %v812_v58 = vrot.slane %v777_v55, 1  ;;  %v806_v59 = vrot.slane %v777_v55, 7 }
 0x2b4   :  { %818 = vrot.lane.b32.xlu0 %v777_v55, %s1428_s0 }
 0x2b5   :  { %v813_v60 = vsel %vm311_vm2, %v811_v57, %v812_v58  ;;  %v807_v61 = vsel %vm298_vm0, %v805_v56, %v806_v59  ;;  %v815_v1 = vsel %vm311_vm2, %v812_v58, 0.0 }
 0x2b6   :  { %1146 = vmatprep.mubr.msk.f32.mxu0 %vm822_vm3, %v813_v60 }
 0x322   :  { %v817_v62 = vpop.permute.xlu0 %816 }
 0x323   :  { %v823_v0 = vsel %vm822_vm3, %v810_v63, %v817_v62 }
 0x324   :  { %901 = vmatmul.mubr.f32.vlgmr.msra.gmra.mxu0 %v823_v0 }
 0x325   :  { %1147 = vmatprep.mubr.msk.f32.mxu0 %vm822_vm3, %v815_v1 }
 0x326   :  { %v819_v2 = vpop.permute.xlu0 %818 }
 0x327   :  { %v824_v4 = vsel %vm822_vm3, %v807_v61, %v819_v2 }
 0x328   :  { %906 = vmatmul.mubr.f32.gmra.mxu0 %v824_v4 }
 0x3e4   :  { %v902_v9 = vpop.f32.mrf.mxu0 }
 0x3e5   :  { %v903_v10 = vadd.f32 %v1145_v8, %v902_v9 }
 0x3e6   :  { %v904_v11 = vpop.f32.mrf.mxu0 }
 0x3e7   :  { %v911_v13 = vmax.f32 %v903_v10, 0.0 }
 0x3e8   :  { %v907_v14 = vpop.f32.mrf.mxu0 }
 0x3e9   :  { %v908_v15 = vadd.f32 %v1145_v8, %v907_v14  ;;  %1385 = vmatprep.mubr.msk.f32.mxu1 %vm922_vm5, %v911_v13 }
 0x3ea   :  { %v909_v16 = vpop.f32.mrf.mxu0 }
 0x3eb   :  { %v912_v17 = vmax.f32 %v908_v15, 0.0 }
 0x3ed   :  { %1386 = vmatmul.mubr.msk.f32.vlgmr.msra.gmra.mxu1 %vm922_vm5, %v912_v17 }
 0x3ee   :  { %1389 = vmatpush3.msk.msra.mxu1 %vm1031_vm4, %v1016_v7 }
 0x3ef   :  { %1390 = vmatprep.subr.mxu1 %v1015_v18 }
 0x3f0   :  { %1391 = vmatpush3.msra.mxu1 %v1015_v18 }
 0x3f1   :  { %1392 = vmatprep.subr.mxu1 %v1014_v12 }
 0x3f2   :  { %1393 = vmatpush3.msra.mxu1 %v1014_v12 }
 0x3f3   :  { %1394 = vmatprep.subr.mxu1 %v1013_v19 }
 0x3f4   :  { %1395 = vmatpush3.msra.mxu1 %v1013_v19 }
 0x3f5   :  { %1396 = vmatprep.subr.mxu1 %v1012_v20 }
 0x3f6   :  { %1397 = vmatpush3.msra.mxu1 %v1012_v20 }
 0x3f7   :  { %1398 = vmatprep.subr.mxu1 %v1011_v21 }
 0x3f8   :  { %1399 = vmatpush3.msra.mxu1 %v1011_v21 }
 0x3f9   :  { %1400 = vmatprep.subr.mxu1 %v1010_v22 }
 0x3fa   :  { %1401 = vmatpush3.msra.mxu1 %v1010_v22 }
 0x3fb   :  { %1402 = vmatprep.subr.mxu1 %v1009_v23 }
 0x3fc   :  { %1403 = vmatpush3.msra.mxu1 %v1009_v23 }
 0x3fd   :  { %1404 = vmatprep.subr.mxu1 %v1008_v24 }
 0x3fe   :  { %1405 = vmatpush3.msra.mxu1 %v1008_v24 }
 0x3ff   :  { %1406 = vmatprep.subr.mxu1 %v1007_v25 }
 0x400   :  { %1407 = vmatpush3.msra.mxu1 %v1007_v25 }
 0x401   :  { %1408 = vmatprep.subr.mxu1 %v1006_v26 }
 0x402   :  { %1409 = vmatpush3.msra.mxu1 %v1006_v26 }
 0x403   :  { %1410 = vmatprep.subr.mxu1 %v1005_v27 }
 0x404   :  { %1411 = vmatpush3.msra.mxu1 %v1005_v27 }
 0x405   :  { %1412 = vmatprep.subr.mxu1 %v1004_v28 }
 0x406   :  { %1413 = vmatpush3.msra.mxu1 %v1004_v28 }
 0x4ad   :  { %v1387_v29 = vpop.f32.mrf.mxu1 }
 0x4ae   :  { %v1001_v33 = vadd.f32 %v1387_v29, %v1148_v30 }
 0x4af   :  { %v995_v31 = vpop.f32.mrf.mxu1 }
 0x4b0   :  { %v996_v32 = vadd.f32 %v1148_v30, %v995_v31 }
 0x4b2   :  { %1414 = vmatprep.mubr.msk.f32.mxu1 %vm1024_vm6, %v996_v32 }
 0x4b3   :  { %1415 = vmatmul.mubr.msk.f32.vlgmr.msra.gmra.mxu1 %vm1024_vm6, %v1001_v33 }
 0x573   :  { %v1416_v35 = vpop.f32.mrf.mxu1 }
 0x574   :  { %v1107_v36 = vadd.f32 %v1416_v35, %v1151_v34 }
 0x575   :  { %v1101_v37 = vpop.f32.mrf.mxu1 }
 0x576   :  { %v1156_v38 = vmul.f32 -1.442695, %v1107_v36  ;;  %v1102_v40 = vadd.f32 %v1151_v34, %v1101_v37 }
 0x578   :  { %1419 = vpow2.f32 %v1156_v38  ;;  %v1155_v41 = vmul.f32 -1.442695, %v1102_v40 }
 0x57a   :  { %1421 = vpow2.f32 %v1155_v41 }
 0x585   :  { %v1420_v42 = vpop.eup %1419 }
 0x586   :  { %v1120_v43 = vadd.f32 1.0, %v1420_v42 }
 0x587   :  { %v1422_v44 = vpop.eup %1421 }
 0x588   :  { %1423 = vrcp.f32 %v1120_v43  ;;  %v1119_v45 = vadd.f32 1.0, %v1422_v44 }
 0x58a   :  { %1425 = vrcp.f32 %v1119_v45 }
 0x595   :  { %v1424_v47 = vpop.eup %1423 }
 0x596   :  { %v1126_v48 = vsel %vm1112_vm7, %v1424_v47, %v1107_v36 }
 0x597   :  { %v1426_v49 = vpop.eup %1425  ;;  %1129 = vst.msk [vmem:[%s2272_s13 + $0x8] sm:$0xff] %vm1127_vm8, %v1126_v48 }
 0x598   :  { %v1125_v50 = vsel %vm1112_vm7, %v1426_v49, %v1102_v40 }
 0x599   :  { %1128 = vst.msk [vmem:[%s2272_s13] sm:$0xff] %vm1127_vm8, %v1125_v50 }

</bundles_post_ra>
